<compile_context>
chip_gen: v6e
topology: v6e:2x2x1
jax: 0.10.0
libtpu: 0.0.40
codegen_flags: <defaults>
</compile_context>

<pallas_src>
import functools

import jax
import jax.numpy as jnp
import numpy as np
from jax.experimental import pallas as pl
from jax.experimental.pallas import tpu as pltpu


# ------------------------------- Pallas kernel -------------------------------

def _activate(y, act):
    if act == "relu":
        return jnp.maximum(y, 0.0)
    # hard-swish (HS module): y * clamp(y + 3, 0, 6) / 6
    return y * jnp.clip(y + 3.0, 0.0, 6.0) * (1.0 / 6.0)


def _shuffle_unit_kernel(x_ref, wf_ref, wm_ref, w2_ref, b_ref, o_ref,
                         *, H, W, ksize, nb, inp, mid, outputs, act):
    """Fused ShuffleNetV2 stride-1 unit for a block of `nb` batch elements.

    x_ref : (nb, 2*inp, H*W)          input, channels on sublanes / spatial on lanes
    wf_ref: (inp+mid, 2*inp)  bf16    [even-channel selection ; pw1*BN1scale (odd cols)]
    wm_ref: (k*k, mid, H*W)   f32     depthwise tap weight * BN2 scale * border mask
    w2_ref: (outputs, mid)    bf16    pw2 * BN3 scale
    b_ref : (mid+outputs, 1)  f32     [BN1 bias ; BN3 bias + w2 @ BN2 bias]
    o_ref : (nb, inp+outputs, H*W)    output slab (passthrough + branch_main)
    """
    HW = H * W
    pad = ksize // 2

    wf = wf_ref[...]                               # bf16 (inp+mid, 2*inp)
    w2 = w2_ref[...]                               # bf16 (outputs, mid)
    b1 = b_ref[0:mid, :]                           # f32  (mid, 1)
    b3 = b_ref[mid:mid + outputs, :]               # f32  (outputs, 1)

    for b in range(nb):                            # static, unrolled (nb is tiny)
        x_full = x_ref[b]                          # (2*inp, HW) f32

        # ---- fused [channel-shuffle passthrough ; 1x1 conv + BN1 scale] ----
        front = jnp.dot(wf, x_full.astype(jnp.bfloat16),
                        preferred_element_type=jnp.float32)   # (inp+mid, HW)
        o_ref[b, 0:inp, :] = front[0:inp, :].astype(o_ref.dtype)

        # ---- BN1 bias + activation -----------------------------------------
        y = _activate(front[inp:inp + mid, :] + b1, act)       # (mid, HW) f32

        # ---- depthwise ksize x ksize conv (stride 1, zero padding) ---------
        # Spatial (dh, dw) shifts are lane rotations of the flattened H*W axis;
        # zero-padding + BN2 scale are pre-folded into wm, so each tap is one
        # vmul + one vadd (rolls ride the XLU slot).
        acc = jnp.zeros_like(y)
        for kh in range(ksize):
            for kw in range(ksize):
                t = kh * ksize + kw
                off = (kh - pad) * W + (kw - pad)
                shifted = y if off == 0 else pltpu.roll(y, (-off) % HW, axis=1)
                acc = acc + shifted * wm_ref[t]

        # ---- 1x1 conv (BN3 scale folded) + fused BN2/BN3 bias + activation -
        z = jnp.dot(w2, acc.astype(jnp.bfloat16),
                    preferred_element_type=jnp.float32)        # (outputs, HW)
        z = _activate(z + b3, act)
        o_ref[b, inp:inp + outputs, :] = z.astype(o_ref.dtype)


def shuffle_unit_forward(x_nchw, kp, *, ksize, inp, mid, outputs, act,
                         max_parallel_steps=2):
    """Run the fused unit.  x_nchw: (N, 2*inp, H, W) float32."""
    n, c, h, w = x_nchw.shape
    hw = h * w
    c_out = inp + outputs
    assert c == 2 * inp
    assert hw % 128 == 0 and c % 8 == 0 and c_out % 8 == 0 and mid % 8 == 0

    # Batch blocking: <= max_parallel_steps grid steps (2 keeps both v7x TCs busy;
    # on 1-TC chips the extra step costs < 1 us), each step takes nb images.
    steps = max(1, min(n, max_parallel_steps))
    nb = pl.cdiv(n, steps)
    n_pad = steps * nb

    x3 = x_nchw.reshape(n, c, hw)   # free reshape: NCHW is already (C, H*W)-major
    if n_pad != n:
        x3 = jnp.concatenate(
            [x3, jnp.zeros((n_pad - n, c, hw), x3.dtype)], axis=0)

    kernel = functools.partial(_shuffle_unit_kernel, H=h, W=w, ksize=ksize,
                               nb=nb, inp=inp, mid=mid, outputs=outputs, act=act)
    out = pl.pallas_call(
        kernel,
        out_shape=jax.ShapeDtypeStruct((n_pad, c_out, hw), x_nchw.dtype),
        grid_spec=pltpu.PrefetchScalarGridSpec(
            num_scalar_prefetch=0,
            grid=(steps,),
            in_specs=[
                pl.BlockSpec((nb, c, hw), lambda i: (i, 0, 0)),              # x block
                pl.BlockSpec((inp + mid, c), lambda i: (0, 0)),              # fused sel+pw1 (bf16)
                pl.BlockSpec((ksize * ksize, mid, hw), lambda i: (0, 0, 0)),  # dw taps*masks
                pl.BlockSpec((outputs, mid), lambda i: (0, 0)),              # pw2 (bf16)
                pl.BlockSpec((mid + outputs, 1), lambda i: (0, 0)),          # packed biases
            ],
            out_specs=pl.BlockSpec((nb, c_out, hw), lambda i: (i, 0, 0)),
        ),
        compiler_params=pltpu.CompilerParams(
            dimension_semantics=("parallel",)),
    )(x3, kp["wf"], kp["wm"], kp["w2"], kp["bias"])

    if n_pad != n:
        out = out[:n]
    return out.reshape(n, c_out, h, w)


# ------------------------------- Module glue ---------------------------------

def fold_bn(gamma, beta, mean, var, eps=1e-5):
    scale = gamma / jnp.sqrt(var + eps)
    bias = beta - mean * scale
    return scale, bias


def channel_shuffle(x):
    b, c, h, w = x.shape
    assert c % 4 == 0
    x = x.reshape(b * c // 2, 2, h * w)
    x = jnp.transpose(x, (1, 0, 2))
    x = x.reshape(2, -1, c // 2, h, w)
    return x[0], x[1]


class ShufflenetPallas:
    def __init__(self, inp, oup, base_mid_channels, *, ksize, stride,
                 activation, useSE, key, H, W):
        assert stride in (1, 2)
        assert ksize in (3, 5, 7)
        assert base_mid_channels == oup // 2
        assert stride == 1  # TODO(synk): stride=2 (branch_proj) path not implemented
        assert not useSE    # TODO(synk): SELayer not implemented (ReLU config forbids it anyway)
        self.inp = inp
        self.oup = oup
        self.mid = base_mid_channels
        self.ksize = ksize
        self.pad = ksize // 2
        self.stride = stride
        self.act = "relu" if activation == "ReLU" else "hs"
        self.outputs = oup - inp

        ks = list(jax.random.split(key, 6))

        def normal(k, shape, s=0.1):
            return s * jax.random.normal(k, shape, jnp.float32)

        def bn_params(k, c):
            k1, k2, k3, k4 = jax.random.split(k, 4)
            gamma = 1.0 + 0.1 * jax.random.normal(k1, (c,), jnp.float32)
            beta = 0.1 * jax.random.normal(k2, (c,), jnp.float32)
            mean = 0.1 * jax.random.normal(k3, (c,), jnp.float32)
            var = 0.5 + jnp.abs(jax.random.normal(k4, (c,), jnp.float32))
            return fold_bn(gamma, beta, mean, var)

        # Raw parameters in PyTorch layouts (also used by the pure-JAX reference)
        self.w_pw1 = normal(ks[0], (self.mid, inp))              # Conv2d(inp, mid, 1)
        self.bn1 = bn_params(ks[1], self.mid)
        self.w_dw = normal(ks[2], (self.mid, 1, ksize, ksize))   # depthwise conv
        self.bn2 = bn_params(ks[3], self.mid)
        self.w_pw2 = normal(ks[4], (self.outputs, self.mid))     # Conv2d(mid, outputs, 1)
        self.bn3 = bn_params(ks[5], self.outputs)

        # ---- precompute kernel-side constants (one-time host work) ---------
        s1, b1 = self.bn1
        s2, b2 = self.bn2
        s3, b3 = self.bn3
        c_in = 2 * inp

        # Fused front weight: rows [0:inp] select the even input channels
        # (channel_shuffle passthrough); rows [inp:inp+mid] are the 1x1 conv
        # weight (BN1 scale folded) expanded to all input channels (odd cols).
        sel = jax.nn.one_hot(2 * jnp.arange(inp), c_in, dtype=jnp.float32)
        w1 = jnp.zeros((self.mid, c_in), jnp.float32)
        w1 = w1.at[:, 1::2].set(self.w_pw1 * s1[:, None])
        wf = jnp.concatenate([sel, w1], axis=0)                  # (inp+mid, c_in)

        # Depthwise taps (BN2 scale folded), premultiplied by the per-tap
        # zero-padding border masks over the flattened H*W lane axis.
        wdw = (self.w_dw[:, 0, :, :] * s2[:, None, None]).reshape(
            self.mid, ksize * ksize)
        wdw = jnp.transpose(wdw, (1, 0))                          # (k*k, mid)
        hh = jnp.arange(H).reshape(H, 1)
        ww = jnp.arange(W).reshape(1, W)
        masks = []
        for kh in range(ksize):
            for kw in range(ksize):
                dh, dw = kh - self.pad, kw - self.pad
                m = ((hh + dh >= 0) & (hh + dh < H)
                     & (ww + dw >= 0) & (ww + dw < W))
                masks.append(m.reshape(H * W))
        masks = jnp.stack(masks, axis=0).astype(jnp.float32)      # (k*k, H*W)
        wm = wdw[:, :, None] * masks[:, None, :]                  # (k*k, mid, H*W)

        # Second 1x1 conv with BN3 scale folded; BN2 bias folded into BN3 bias.
        w2 = self.w_pw2 * s3[:, None]
        b3p = b3 + w2 @ b2                                        # exact fold (f32)

        bias = jnp.concatenate([b1, b3p], axis=0).reshape(
            self.mid + self.outputs, 1)

        self.kernel_params = dict(
            wf=wf.astype(jnp.bfloat16),     # MXU operand (f32 accumulate in-kernel)
            wm=wm.astype(jnp.float32),
            w2=w2.astype(jnp.bfloat16),     # MXU operand (f32 accumulate in-kernel)
            bias=bias.astype(jnp.float32))

    def __call__(self, old_x):
        # old_x: (N, oup, H, W) float32 (NCHW, matching PyTorch)
        return shuffle_unit_forward(old_x, self.kernel_params,
                                    ksize=self.ksize, inp=self.inp,
                                    mid=self.mid, outputs=self.outputs,
                                    act=self.act)


# ----------------------------- pure-JAX reference ----------------------------

def ref_forward(model, old_x):
    x_proj, x = channel_shuffle(old_x)

    def bn_apply(y, sb):
        s, b = sb
        return y * s[None, :, None, None] + b[None, :, None, None]

    if model.act == "relu":
        act = lambda v: jnp.maximum(v, 0.0)
    else:
        act = lambda v: v * jnp.clip(v + 3.0, 0.0, 6.0) / 6.0

    y = jnp.einsum('nchw,oc->nohw', x, model.w_pw1,
                   precision=jax.lax.Precision.HIGHEST)
    y = act(bn_apply(y, model.bn1))
    y = jax.lax.conv_general_dilated(
        y, model.w_dw, window_strides=(1, 1),
        padding=[(model.pad, model.pad)] * 2,
        feature_group_count=model.mid,
        dimension_numbers=('NCHW', 'OIHW', 'NCHW'),
        precision=jax.lax.Precision.HIGHEST)
    y = bn_apply(y, model.bn2)
    y = jnp.einsum('nchw,oc->nohw', y, model.w_pw2,
                   precision=jax.lax.Precision.HIGHEST)
    y = act(bn_apply(y, model.bn3))
    return jnp.concatenate((x_proj, y), axis=1)


# ----------------------------------- main -------------------------------------

if __name__ == "__main__":
    key = jax.random.PRNGKey(0)
    k_in, k_params = jax.random.split(key)

    N, inp, oup, H, W = 2, 8, 16, 16, 16   # stride=1 unit: input has `oup` channels
    model = ShufflenetPallas(inp, oup, oup // 2, ksize=3, stride=1,
                             activation="ReLU", useSE=False, key=k_params,
                             H=H, W=W)

    old_x = jax.random.normal(k_in, (N, oup, H, W), jnp.float32)

    fwd = jax.jit(lambda t: model(t))
    out = jax.block_until_ready(fwd(old_x))
    ref = jax.block_until_ready(ref_forward(model, old_x))

    assert out.shape == (N, oup, H, W), out.shape
    np.testing.assert_allclose(np.asarray(out), np.asarray(ref),
                               rtol=1e-2, atol=1e-2)
    print("KERNEL_OK")
</pallas_src>

<mosaic_0001>
module attributes {stable_mosaic.version = 11 : i64} {
  func.func @_shuffle_unit_kernel(%arg0: i32, %arg1: memref<1x16x256xf32, #tpu.memory_space<vmem>>, %arg2: memref<16x16xbf16, #tpu.memory_space<vmem>>, %arg3: memref<9x8x256xf32, #tpu.memory_space<vmem>>, %arg4: memref<8x8xbf16, #tpu.memory_space<vmem>>, %arg5: memref<16x1xf32, #tpu.memory_space<vmem>>, %arg6: memref<1x16x256xf32, #tpu.memory_space<vmem>>) attributes {dimension_semantics = [#tpu.dimension_semantics<parallel>], iteration_bounds = array<i64: 2>, scalar_prefetch = 0 : i64, scratch_operands = 0 : i64, tpu.core_type = #tpu.core_type<tc>, window_params = [{transform_indices = @transform_0, window_bounds = array<i64: 1, 16, 256>}, {pipeline_mode = #tpu.pipeline_mode<synchronous>, transform_indices = @transform_1, window_bounds = array<i64: 16, 16>}, {pipeline_mode = #tpu.pipeline_mode<synchronous>, transform_indices = @transform_2, window_bounds = array<i64: 9, 8, 256>}, {pipeline_mode = #tpu.pipeline_mode<synchronous>, transform_indices = @transform_3, window_bounds = array<i64: 8, 8>}, {pipeline_mode = #tpu.pipeline_mode<synchronous>, transform_indices = @transform_4, window_bounds = array<i64: 16, 1>}, {transform_indices = @transform_5, window_bounds = array<i64: 1, 16, 256>}]} {
    %c0 = arith.constant 0 : index
    %c0_0 = arith.constant 0 : index
    %0 = vector.load %arg2[%c0, %c0_0] : memref<16x16xbf16, #tpu.memory_space<vmem>>, vector<16x16xbf16>
    %c0_1 = arith.constant 0 : index
    %c0_2 = arith.constant 0 : index
    %1 = vector.load %arg4[%c0_1, %c0_2] : memref<8x8xbf16, #tpu.memory_space<vmem>>, vector<8x8xbf16>
    %c0_3 = arith.constant 0 : index
    %c0_4 = arith.constant 0 : index
    %2 = vector.load %arg5[%c0_3, %c0_4] : memref<16x1xf32, #tpu.memory_space<vmem>>, vector<8x1xf32>
    %c8 = arith.constant 8 : index
    %c0_5 = arith.constant 0 : index
    %3 = vector.load %arg5[%c8, %c0_5] : memref<16x1xf32, #tpu.memory_space<vmem>>, vector<8x1xf32>
    %c0_6 = arith.constant 0 : index
    %c0_7 = arith.constant 0 : index
    %c0_8 = arith.constant 0 : index
    %4 = vector.load %arg1[%c0_6, %c0_7, %c0_8] : memref<1x16x256xf32, #tpu.memory_space<vmem>>, vector<1x16x256xf32>
    %5 = vector.shape_cast %4 : vector<1x16x256xf32> to vector<16x256xf32>
    %6 = arith.truncf %5 : vector<16x256xf32> to vector<16x256xbf16>
    %cst = arith.constant dense<0.000000e+00> : vector<16x256xf32>
    %7 = tpu.matmul %0, %6, %cst {dimension_numbers = #tpu.dot_dimension_numbers<[1], [0], [0], [1], [0, 0, 1, 1], [], []>} : vector<16x16xbf16>, vector<16x256xbf16>, vector<16x256xf32> -> vector<16x256xf32>
    %8 = vector.extract_strided_slice %7 {offsets = [0, 0], sizes = [8, 256], strides = [1, 1]} : vector<16x256xf32> to vector<8x256xf32>
    %c0_9 = arith.constant 0 : index
    %c0_10 = arith.constant 0 : index
    %c0_11 = arith.constant 0 : index
    %9 = vector.load %arg6[%c0_9, %c0_10, %c0_11] : memref<1x16x256xf32, #tpu.memory_space<vmem>>, vector<1x8x256xf32>
    %10 = vector.shape_cast %9 : vector<1x8x256xf32> to vector<8x256xf32>
    %11 = vector.shape_cast %8 : vector<8x256xf32> to vector<1x8x256xf32>
    tpu.vector_store %arg6[%c0_9, %c0_10, %c0_11], %11 {strides = array<i32>} : memref<1x16x256xf32, #tpu.memory_space<vmem>>, vector<1x8x256xf32>,
    %12 = vector.extract_strided_slice %7 {offsets = [8, 0], sizes = [8, 256], strides = [1, 1]} : vector<16x256xf32> to vector<8x256xf32>
    %13 = vector.broadcast %2 : vector<8x1xf32> to vector<8x256xf32>
    %14 = arith.addf %12, %13 : vector<8x256xf32>
    %cst_12 = arith.constant 0.000000e+00 : f32
    %15 = vector.broadcast %cst_12 : f32 to vector<8x256xf32>
    %16 = arith.maximumf %14, %15 : vector<8x256xf32>
    %cst_13 = arith.constant 0.000000e+00 : f32
    %17 = vector.broadcast %cst_13 : f32 to vector<8x256xf32>
    %c17_i32 = arith.constant 17 : i32
    %18 = tpu.dynamic_rotate %16 by %c17_i32 dim 1 : vector<8x256xf32>, i32 -> vector<8x256xf32>
    %c0_14 = arith.constant 0 : index
    %c0_15 = arith.constant 0 : index
    %c0_16 = arith.constant 0 : index
    %19 = vector.load %arg3[%c0_14, %c0_15, %c0_16] : memref<9x8x256xf32, #tpu.memory_space<vmem>>, vector<1x8x256xf32>
    %20 = vector.shape_cast %19 : vector<1x8x256xf32> to vector<8x256xf32>
    %21 = arith.mulf %18, %20 : vector<8x256xf32>
    %22 = arith.addf %17, %21 : vector<8x256xf32>
    %c16_i32 = arith.constant 16 : i32
    %23 = tpu.dynamic_rotate %16 by %c16_i32 dim 1 : vector<8x256xf32>, i32 -> vector<8x256xf32>
    %c1 = arith.constant 1 : index
    %c0_17 = arith.constant 0 : index
    %c0_18 = arith.constant 0 : index
    %24 = vector.load %arg3[%c1, %c0_17, %c0_18] : memref<9x8x256xf32, #tpu.memory_space<vmem>>, vector<1x8x256xf32>
    %25 = vector.shape_cast %24 : vector<1x8x256xf32> to vector<8x256xf32>
    %26 = arith.mulf %23, %25 : vector<8x256xf32>
    %27 = arith.addf %22, %26 : vector<8x256xf32>
    %c15_i32 = arith.constant 15 : i32
    %28 = tpu.dynamic_rotate %16 by %c15_i32 dim 1 : vector<8x256xf32>, i32 -> vector<8x256xf32>
    %c2 = arith.constant 2 : index
    %c0_19 = arith.constant 0 : index
    %c0_20 = arith.constant 0 : index
    %29 = vector.load %arg3[%c2, %c0_19, %c0_20] : memref<9x8x256xf32, #tpu.memory_space<vmem>>, vector<1x8x256xf32>
    %30 = vector.shape_cast %29 : vector<1x8x256xf32> to vector<8x256xf32>
    %31 = arith.mulf %28, %30 : vector<8x256xf32>
    %32 = arith.addf %27, %31 : vector<8x256xf32>
    %c1_i32 = arith.constant 1 : i32
    %33 = tpu.dynamic_rotate %16 by %c1_i32 dim 1 : vector<8x256xf32>, i32 -> vector<8x256xf32>
    %c3 = arith.constant 3 : index
    %c0_21 = arith.constant 0 : index
    %c0_22 = arith.constant 0 : index
    %34 = vector.load %arg3[%c3, %c0_21, %c0_22] : memref<9x8x256xf32, #tpu.memory_space<vmem>>, vector<1x8x256xf32>
    %35 = vector.shape_cast %34 : vector<1x8x256xf32> to vector<8x256xf32>
    %36 = arith.mulf %33, %35 : vector<8x256xf32>
    %37 = arith.addf %32, %36 : vector<8x256xf32>
    %c4 = arith.constant 4 : index
    %c0_23 = arith.constant 0 : index
    %c0_24 = arith.constant 0 : index
    %38 = vector.load %arg3[%c4, %c0_23, %c0_24] : memref<9x8x256xf32, #tpu.memory_space<vmem>>, vector<1x8x256xf32>
    %39 = vector.shape_cast %38 : vector<1x8x256xf32> to vector<8x256xf32>
    %40 = arith.mulf %16, %39 : vector<8x256xf32>
    %41 = arith.addf %37, %40 : vector<8x256xf32>
    %c255_i32 = arith.constant 255 : i32
    %42 = tpu.dynamic_rotate %16 by %c255_i32 dim 1 : vector<8x256xf32>, i32 -> vector<8x256xf32>
    %c5 = arith.constant 5 : index
    %c0_25 = arith.constant 0 : index
    %c0_26 = arith.constant 0 : index
    %43 = vector.load %arg3[%c5, %c0_25, %c0_26] : memref<9x8x256xf32, #tpu.memory_space<vmem>>, vector<1x8x256xf32>
    %44 = vector.shape_cast %43 : vector<1x8x256xf32> to vector<8x256xf32>
    %45 = arith.mulf %42, %44 : vector<8x256xf32>
    %46 = arith.addf %41, %45 : vector<8x256xf32>
    %c241_i32 = arith.constant 241 : i32
    %47 = tpu.dynamic_rotate %16 by %c241_i32 dim 1 : vector<8x256xf32>, i32 -> vector<8x256xf32>
    %c6 = arith.constant 6 : index
    %c0_27 = arith.constant 0 : index
    %c0_28 = arith.constant 0 : index
    %48 = vector.load %arg3[%c6, %c0_27, %c0_28] : memref<9x8x256xf32, #tpu.memory_space<vmem>>, vector<1x8x256xf32>
    %49 = vector.shape_cast %48 : vector<1x8x256xf32> to vector<8x256xf32>
    %50 = arith.mulf %47, %49 : vector<8x256xf32>
    %51 = arith.addf %46, %50 : vector<8x256xf32>
    %c240_i32 = arith.constant 240 : i32
    %52 = tpu.dynamic_rotate %16 by %c240_i32 dim 1 : vector<8x256xf32>, i32 -> vector<8x256xf32>
    %c7 = arith.constant 7 : index
    %c0_29 = arith.constant 0 : index
    %c0_30 = arith.constant 0 : index
    %53 = vector.load %arg3[%c7, %c0_29, %c0_30] : memref<9x8x256xf32, #tpu.memory_space<vmem>>, vector<1x8x256xf32>
    %54 = vector.shape_cast %53 : vector<1x8x256xf32> to vector<8x256xf32>
    %55 = arith.mulf %52, %54 : vector<8x256xf32>
    %56 = arith.addf %51, %55 : vector<8x256xf32>
    %c239_i32 = arith.constant 239 : i32
    %57 = tpu.dynamic_rotate %16 by %c239_i32 dim 1 : vector<8x256xf32>, i32 -> vector<8x256xf32>
    %c8_31 = arith.constant 8 : index
    %c0_32 = arith.constant 0 : index
    %c0_33 = arith.constant 0 : index
    %58 = vector.load %arg3[%c8_31, %c0_32, %c0_33] : memref<9x8x256xf32, #tpu.memory_space<vmem>>, vector<1x8x256xf32>
    %59 = vector.shape_cast %58 : vector<1x8x256xf32> to vector<8x256xf32>
    %60 = arith.mulf %57, %59 : vector<8x256xf32>
    %61 = arith.addf %56, %60 : vector<8x256xf32>
    %62 = arith.truncf %61 : vector<8x256xf32> to vector<8x256xbf16>
    %cst_34 = arith.constant dense<0.000000e+00> : vector<8x256xf32>
    %63 = tpu.matmul %1, %62, %cst_34 {dimension_numbers = #tpu.dot_dimension_numbers<[1], [0], [0], [1], [0, 0, 1, 1], [], []>} : vector<8x8xbf16>, vector<8x256xbf16>, vector<8x256xf32> -> vector<8x256xf32>
    %64 = vector.broadcast %3 : vector<8x1xf32> to vector<8x256xf32>
    %65 = arith.addf %63, %64 : vector<8x256xf32>
    %cst_35 = arith.constant 0.000000e+00 : f32
    %66 = vector.broadcast %cst_35 : f32 to vector<8x256xf32>
    %67 = arith.maximumf %65, %66 : vector<8x256xf32>
    %c0_36 = arith.constant 0 : index
    %c8_37 = arith.constant 8 : index
    %c0_38 = arith.constant 0 : index
    %68 = vector.load %arg6[%c0_36, %c8_37, %c0_38] : memref<1x16x256xf32, #tpu.memory_space<vmem>>, vector<1x8x256xf32>
    %69 = vector.shape_cast %68 : vector<1x8x256xf32> to vector<8x256xf32>
    %70 = vector.shape_cast %67 : vector<8x256xf32> to vector<1x8x256xf32>
    tpu.vector_store %arg6[%c0_36, %c8_37, %c0_38], %70 {strides = array<i32>} : memref<1x16x256xf32, #tpu.memory_space<vmem>>, vector<1x8x256xf32>,
    return
  }
  func.func @transform_0(%arg0: i32) -> (i32, i32, i32) {
    %c0_i32 = arith.constant 0 : i32
    %c0_i32_0 = arith.constant 0 : i32
    %c0_i32_1 = arith.constant 0 : i32
    return %arg0, %c0_i32, %c0_i32_0 : i32, i32, i32
  }
  func.func @transform_1(%arg0: i32) -> (i32, i32) {
    %c0_i32 = arith.constant 0 : i32
    %c0_i32_0 = arith.constant 0 : i32
    %c0_i32_1 = arith.constant 0 : i32
    return %c0_i32, %c0_i32_0 : i32, i32
  }
  func.func @transform_2(%arg0: i32) -> (i32, i32, i32) {
    %c0_i32 = arith.constant 0 : i32
    %c0_i32_0 = arith.constant 0 : i32
    %c0_i32_1 = arith.constant 0 : i32
    %c0_i32_2 = arith.constant 0 : i32
    return %c0_i32, %c0_i32_0, %c0_i32_1 : i32, i32, i32
  }
  func.func @transform_3(%arg0: i32) -> (i32, i32) {
    %c0_i32 = arith.constant 0 : i32
    %c0_i32_0 = arith.constant 0 : i32
    %c0_i32_1 = arith.constant 0 : i32
    return %c0_i32, %c0_i32_0 : i32, i32
  }
  func.func @transform_4(%arg0: i32) -> (i32, i32) {
    %c0_i32 = arith.constant 0 : i32
    %c0_i32_0 = arith.constant 0 : i32
    %c0_i32_1 = arith.constant 0 : i32
    return %c0_i32, %c0_i32_0 : i32, i32
  }
  func.func @transform_5(%arg0: i32) -> (i32, i32, i32) {
    %c0_i32 = arith.constant 0 : i32
    %c0_i32_0 = arith.constant 0 : i32
    %c0_i32_1 = arith.constant 0 : i32
    return %arg0, %c0_i32, %c0_i32_0 : i32, i32, i32
  }
}

</mosaic_0001>

<bundles_post_ra>
// kernel: _lambda_.1
= control target key start
LH: loop header
LB: loop body
LE: loop exit
PB: predicated region body
PF: predicated region fallthrough
CT: control target
= control target key end

     0   :  { %s638_s18 = smov 0   ;;  %s771_s0 = inlined_call_operand.vmem [shape: f32[2,16,256], index: 0, kind: input, shape index: {}]   ;;  %s772_s1 = inlined_call_operand.vmem [shape: bf16[16,16], index: 1, kind: input, shape index: {}]   ;;  %s773_s2 = inlined_call_operand.vmem [shape: f32[9,8,256], index: 2, kind: input, shape index: {}]   ;;  %s774_s3 = inlined_call_operand.vmem [shape: bf16[8,8], index: 3, kind: input, shape index: {}]   ;;  %s775_s4 = inlined_call_operand.vmem [shape: f32[16,1], index: 4, kind: input, shape index: {}]   ;;  %s776_s5 = inlined_call_operand.vmem [shape: f32[2,16,256], index: 5, kind: output, shape index: {}]  }
   0x1 LB: > { %s538_s19 = sadd.s32 4294967295, %s597_s18   ;;  %p542_p0 = scmp.ge.s32.totalorder %s597_s18, 1  ;;  %s597_s18 = sphi %s638_s18, %s15_s18  }
   0x2   : > { %p187_p1 = scmp.lt.s32.totalorder %s597_s18, 3 }
   0x4   : > { %p188_p2 = pnand %p542_p0, %p187_p1 }
   0x5   : > { %p215_p3 = scmp.lt.s32.totalorder (!%p188_p2), %s538_s19, 1  ;;  %s600_s6 = smov (!%p188_p2), 16  }
   0x6   : > { %191 = sbr.rel (%p188_p2) target bundleno = 576 (0x240), region = 40  ;;  %s601_s7 = smov (!%p188_p2), 17  }
   0x7   : > { %s602_s8 = smov (!%p188_p2), 15   ;;  %s603_s9 = smov (!%p188_p2), 1  }
   0x8   : > { %s604_s10 = smov (!%p188_p2), 127   ;;  %s605_s11 = smov (!%p188_p2), 113  }
   0x9   : > { %s606_s12 = smov (!%p188_p2), 112   ;;  %s607_s13 = smov (!%p188_p2), 111  }
   0xb   : > { %v599_v0 = vmov 0   ;;  %v229_v1 = vld [vmem:[%s775_s4] sm:$0xff]  ;;  %s778_s19 = smov (!%p215_p3, %s538_s19), 1  ;;  %vm242_vm0 = vcmask 130048   ;;  %v230_v18 = vld [vmem:[%s775_s4 + $0x8] sm:$0xff]  ;;  %v304_v21 = vlaneseq  ;;  %v549_v27 = vld [vmem:[%s773_s2 + $0x10] sm:$0xff] }
   0xc   : > { %278 = vmatprep.mubr.bf16.mxu0 %v599_v0  ;;  %588 = vset.pattern.permute.xlu0 %v599_v0  ;;  %s569_s22 = sshll.u32 %s778_s19, 5  ;;  %v590_v8 = vld [vmem:[%s772_s1] sm:$0xff]   ;;  %v550_v28 = vld [vmem:[%s773_s2 + $0x18] sm:$0xff]  ;;  %v310_v32 = vld [vmem:[%s773_s2 + $0x8] sm:$0xff]  ;;  %vm431_vm9 = vcmask 1043456   ;;  %vm427_vm10 = vcmask 64512  }
   0xd   : > { %293 = vperm.xlu0 %588, %v229_v1   ;;  %470 = vmatprep.mubr.bf16.mxu1 %v599_v0  ;;  %s219_s25 = scalar_lea.vmem %s771_s0, %s569_s22  ;;  %s658_s30 = scalar_lea.vmem %s776_s5, %s569_s22  ;;  %v685_v23 = vand.u32 127, %v304_v21  ;;  %v309_v31 = vld [vmem:[%s773_s2] sm:$0xff]  ;;  %v552_v36 = vld [vmem:[%s773_s2 + $0x28] sm:$0xff]  ;;  %v553_v45 = vld [vmem:[%s773_s2 + $0x30] sm:$0xff] }
   0xe   : > { %589 = vset.pattern.permute.xlu1 %v599_v0  ;;  %v232_v2 = vld [vmem:[%s219_s25 + $0x8] sm:$0xff]  ;;  %v234_v3 = vld [vmem:[%s219_s25 + $0x18] sm:$0xff]  ;;  %v231_v4 = vld [vmem:[%s219_s25] sm:$0xff] }
   0xf   : > { %v236_v5 = vpack.c.bf16 %v234_v3, %v232_v2  ;;  %v233_v6 = vld [vmem:[%s219_s25 + $0x10] sm:$0xff]  ;;  %vm319_vm1 = vcmp.lt.s32.totalorder %v685_v23, 16  ;;  %vm333_vm2 = vcmp.lt.s32.totalorder %v685_v23, 15  ;;  %vm306_vm3 = vcmp.lt.s32.totalorder %v685_v23, 17  ;;  %v551_v35 = vld [vmem:[%s773_s2 + $0x20] sm:$0xff]  ;;  %v554_v46 = vld [vmem:[%s773_s2 + $0x38] sm:$0xff] }
  0x10   : > { %v235_v7 = vpack.c.bf16 %v233_v6, %v231_v4  ;;  %vm347_vm4 = vcmp.lt.s32.totalorder %v685_v23, 1  ;;  %vm368_vm5 = vcmp.lt.s32.totalorder %v685_v23, 127  ;;  %v555_v55 = vld [vmem:[%s773_s2 + $0x40] sm:$0xff]  ;;  %v556_v56 = vld [vmem:[%s773_s2 + $0x48] sm:$0xff]  ;;  %vm382_vm6 = vcmp.lt.s32.totalorder %v685_v23, 113  ;;  %v557_v61 = vld [vmem:[%s773_s2 + $0x50] sm:$0xff] }
  0x11   : > { %260 = vmatprep.subr.bf16.mxu0 %v236_v5  ;;  %v558_v62 = vld [vmem:[%s773_s2 + $0x58] sm:$0xff]  ;;  %vm396_vm7 = vcmp.lt.s32.totalorder %v685_v23, 112  ;;  %vm410_vm8 = vcmp.lt.s32.totalorder %v685_v23, 111 }
  0x12   : > { %261 = vmatpush1.bf16.msra.mxu0 %v235_v7  ;;  %v559_v7 = vld [vmem:[%s773_s2 + $0x60] sm:$0xff] }
  0x15   : > { %548 = vmatmul.mubr.msk.bf16.vlgmr.msra.gmra.mxu0 %vm242_vm0, %v590_v8  ;;  %v560_v8 = vld [vmem:[%s773_s2 + $0x68] sm:$0xff] }
  0x88   : > { %v294_v11 = vpop.permute.xlu0 %293 }
  0xd5   : > { %v280_v9 = vpop.f32.mrf.mxu0 }
  0xd6   : > { %289 = vst [vmem:[%s658_s30] sm:$0xff] %v280_v9 }
  0xd7   : > { %v282_v10 = vpop.f32.mrf.mxu0 }
  0xd8   : > { %290 = vst [vmem:[%s658_s30 + $0x8] sm:$0xff] %v282_v10 }
  0xd9   : > { %v284_v12 = vpop.f32.mrf.mxu0 }
  0xda   : > { %v296_v13 = vadd.f32 %v294_v11, %v284_v12 }
  0xdb   : > { %v286_v14 = vpop.f32.mrf.mxu0 }
  0xdc   : > { %v662_v15 = vmax.f32 %v296_v13, 0.0  ;;  %v297_v16 = vadd.f32 %v294_v11, %v286_v14 }
  0xde   : > { %315 = vrot.lane.b32.xlu1 %v662_v15, %s600_s6  ;;  %300 = vrot.lane.b32.xlu0 %v662_v15, %s601_s7  ;;  %v666_v17 = vmax.f32 %v297_v16, 0.0  ;;  %v360_v3 = vmul.f32 %v555_v55, %v662_v15  ;;  %v562_v16 = vld [vmem:[%s773_s2 + $0x78] sm:$0xff] }
  0xe0   : > { %v361_v4 = vmul.f32 %v556_v56, %v666_v17 }
  0xe2   : > { %329 = vrot.lane.b32.xlu1 %v662_v15, %s602_s8  ;;  %317 = vrot.lane.b32.xlu0 %v666_v17, %s600_s6 }
  0xe6   : > { %343 = vrot.lane.b32.xlu1 %v662_v15, %s603_s9  ;;  %331 = vrot.lane.b32.xlu0 %v666_v17, %s602_s8 }
  0xea   : > { %345 = vrot.lane.b32.xlu0 %v666_v17, %s603_s9  ;;  %302 = vrot.lane.b32.xlu1 %v666_v17, %s601_s7 }
  0xee   : > { %366 = vrot.lane.b32.xlu0 %v666_v17, %s604_s10  ;;  %364 = vrot.lane.b32.xlu1 %v662_v15, %s604_s10 }
  0xf2   : > { %380 = vrot.lane.b32.xlu0 %v666_v17, %s605_s11  ;;  %378 = vrot.lane.b32.xlu1 %v662_v15, %s605_s11 }
  0xf6   : > { %394 = vrot.lane.b32.xlu0 %v666_v17, %s606_s12  ;;  %392 = vrot.lane.b32.xlu1 %v662_v15, %s606_s12 }
  0xfa   : > { %408 = vrot.lane.b32.xlu0 %v666_v17, %s607_s13  ;;  %406 = vrot.lane.b32.xlu1 %v662_v15, %s607_s13  ;;  %v561_v15 = vld [vmem:[%s773_s2 + $0x70] sm:$0xff] }
  0xfe   : > { %424 = vperm.xlu1 %589, %v230_v18  }
 0x150   : > { %v316_v19 = vpop.permute.xlu1 %315  ;;  %v301_v20 = vpop.permute.xlu0 %300 }
 0x154   : > { %v330_v22 = vpop.permute.xlu1 %329  ;;  %v318_v24 = vpop.permute.xlu0 %317 }
 0x155   : > { %v320_v29 = vsel %vm319_vm1, %v316_v19, %v318_v24  ;;  %v321_v30 = vsel %vm319_vm1, %v318_v24, %v316_v19 }
 0x156   : > { %v325_v41 = vmul.f32 %v549_v27, %v321_v30  ;;  %v326_v42 = vmul.f32 %v550_v28, %v320_v29  ;;  %v563_v30 = vld [vmem:[%s773_s2 + $0x80] sm:$0xff] }
 0x158   : > { %v344_v25 = vpop.permute.xlu1 %343  ;;  %v332_v26 = vpop.permute.xlu0 %331 }
 0x159   : > { %v334_v37 = vsel %vm333_vm2, %v330_v22, %v332_v26  ;;  %v335_v38 = vsel %vm333_vm2, %v332_v26, %v330_v22 }
 0x15a   : > { %v339_v49 = vmul.f32 %v551_v35, %v335_v38  ;;  %v340_v50 = vmul.f32 %v552_v36, %v334_v37 }
 0x15c   : > { %v346_v33 = vpop.permute.xlu0 %345  ;;  %v303_v34 = vpop.permute.xlu1 %302 }
 0x15d   : > { %v307_v39 = vsel %vm306_vm3, %v301_v20, %v303_v34  ;;  %v308_v40 = vsel %vm306_vm3, %v303_v34, %v301_v20  ;;  %v348_v47 = vsel %vm347_vm4, %v344_v25, %v346_v33  ;;  %v349_v48 = vsel %vm347_vm4, %v346_v33, %v344_v25 }
 0x15e   : > { %v311_v43 = vmul.f32 %v309_v31, %v308_v40  ;;  %v312_v44 = vmul.f32 %v310_v32, %v307_v39  ;;  %v353_v57 = vmul.f32 %v553_v45, %v349_v48  ;;  %v354_v58 = vmul.f32 %v554_v46, %v348_v47  ;;  %v564_v31 = vld [vmem:[%s773_s2 + $0x88] sm:$0xff] }
 0x160   : > { %v327_v51 = vadd.f32 %v325_v41, %v311_v43  ;;  %v328_v52 = vadd.f32 %v326_v42, %v312_v44  ;;  %v367_v53 = vpop.permute.xlu0 %366  ;;  %v365_v54 = vpop.permute.xlu1 %364  ;;  %v228_v44 = vld [vmem:[%s774_s3] sm:$0xf] }
 0x161   : > { %v369_v63 = vsel %vm368_vm5, %v365_v54, %v367_v53  ;;  %v370_v0 = vsel %vm368_vm5, %v367_v53, %v365_v54 }
 0x162   : > { %v341_v59 = vadd.f32 %v339_v49, %v327_v51  ;;  %v342_v60 = vadd.f32 %v340_v50, %v328_v52  ;;  %v374_v13 = vmul.f32 %v557_v61, %v369_v63  ;;  %v375_v14 = vmul.f32 %v558_v62, %v370_v0 }
 0x164   : > { %v355_v1 = vadd.f32 %v353_v57, %v341_v59  ;;  %v356_v2 = vadd.f32 %v354_v58, %v342_v60  ;;  %v381_v5 = vpop.permute.xlu0 %380  ;;  %v379_v6 = vpop.permute.xlu1 %378 }
 0x165   : > { %v383_v9 = vsel %vm382_vm6, %v379_v6, %v381_v5  ;;  %v384_v10 = vsel %vm382_vm6, %v381_v5, %v379_v6 }
 0x166   : > { %v362_v11 = vadd.f32 %v360_v3, %v355_v1  ;;  %v363_v12 = vadd.f32 %v361_v4, %v356_v2  ;;  %v388_v19 = vmul.f32 %v559_v7, %v383_v9  ;;  %v389_v20 = vmul.f32 %v560_v8, %v384_v10 }
 0x168   : > { %v376_v17 = vadd.f32 %v374_v13, %v362_v11  ;;  %v377_v18 = vadd.f32 %v375_v14, %v363_v12  ;;  %v395_v21 = vpop.permute.xlu0 %394  ;;  %v393_v22 = vpop.permute.xlu1 %392 }
 0x169   : > { %v397_v24 = vsel %vm396_vm7, %v393_v22, %v395_v21  ;;  %v398_v25 = vsel %vm396_vm7, %v395_v21, %v393_v22 }
 0x16a   : > { %v390_v26 = vadd.f32 %v388_v19, %v376_v17  ;;  %v391_v27 = vadd.f32 %v389_v20, %v377_v18  ;;  %v402_v28 = vmul.f32 %v561_v15, %v397_v24  ;;  %v403_v29 = vmul.f32 %v562_v16, %v398_v25 }
 0x16c   : > { %v409_v32 = vpop.permute.xlu0 %408  ;;  %v407_v33 = vpop.permute.xlu1 %406  ;;  %v404_v36 = vadd.f32 %v402_v28, %v390_v26  ;;  %v405_v23 = vadd.f32 %v403_v29, %v391_v27 }
 0x16d   : > { %v411_v34 = vsel %vm410_vm8, %v407_v33, %v409_v32  ;;  %v412_v35 = vsel %vm410_vm8, %v409_v32, %v407_v33 }
 0x16e   : > { %v416_v37 = vmul.f32 %v563_v30, %v411_v34  ;;  %v417_v38 = vmul.f32 %v564_v31, %v412_v35 }
 0x170   : > { %v419_v39 = vadd.f32 %v417_v38, %v405_v23  ;;  %v418_v40 = vadd.f32 %v416_v37, %v404_v36 }
 0x172   : > { %v421_v41 = vpack.c.bf16 %v419_v39, %v419_v39  ;;  %v420_v42 = vpack.c.bf16 %v418_v40, %v418_v40 }
 0x174   : > { %565 = vmatprep.subr.msk.bf16.mxu1 %vm431_vm9, %v421_v41  ;;  %v433_v43 = vsel %vm431_vm9, %v420_v42, 0 }
 0x175   : > { %453 = vmatpush1.bf16.msra.mxu1 %v433_v43 }
 0x178   : > { %566 = vmatmul.mubr.msk.bf16.vlgmr.msra.gmra.mxu1 %vm427_vm10, %v228_v44 }
 0x179   : > { %v425_v45 = vpop.permute.xlu1 %424 }
 0x238   : > { %v472_v46 = vpop.f32.mrf.mxu1 }
 0x239   : > { %v473_v47 = vadd.f32 %v472_v46, %v425_v45 }
 0x23a   : > { %v474_v48 = vpop.f32.mrf.mxu1 }
 0x23b   : > { %v479_v49 = vmax.f32 %v473_v47, 0.0  ;;  %v475_v50 = vadd.f32 %v474_v48, %v425_v45 }
 0x23c   : > { %v476_v51 = vpop.f32.mrf.mxu1 }
 0x23d   : > { %481 = vst [vmem:[%s658_s30 + $0x10] sm:$0xff] %v479_v49  ;;  %v480_v52 = vmax.f32 %v475_v50, 0.0 }
 0x23e   : > { %v477_v53 = vpop.f32.mrf.mxu1 }
 0x23f   : > { %482 = vst [vmem:[%s658_s30 + $0x18] sm:$0xff] %v480_v52 }
 0x240 PF: > { %s15_s18 = sadd.s32 1, %s597_s18  }
 0x241   : > { %p12_p4 = scmp.ge.s32.totalorder %s15_s18, 4  }
 0x243   :  { %14 = sbr.rel (!%p12_p4) target bundleno = 1 (0x1), region = 78 }

</bundles_post_ra>
